<compile_context>
chip_gen: v7x
topology: tpu7x:2x2x1
jax: 0.10.0
libtpu: 0.0.40
codegen_flags: <defaults>
</compile_context>

<pallas_src>
import functools

import jax
import jax.numpy as jnp
import numpy as np
from jax.experimental import pallas as pl
from jax.experimental.pallas import tpu as pltpu


@functools.lru_cache(maxsize=None)
def _interp_matrix_np(in_size: int, out_size: int) -> np.ndarray:
    """Dense bilinear interpolation matrix matching torch.nn.Upsample
    (mode='bilinear', align_corners=False)."""
    scale = in_size / out_size
    dst = np.arange(out_size, dtype=np.float64)
    src = scale * (dst + 0.5) - 0.5
    src = np.maximum(src, 0.0)               # PyTorch clamps negative src to 0
    x0 = np.floor(src).astype(np.int64)
    lam = (src - x0).astype(np.float32)
    x1 = np.minimum(x0 + 1, in_size - 1)
    w = np.zeros((out_size, in_size), dtype=np.float32)
    rows = np.arange(out_size)
    np.add.at(w, (rows, x0), 1.0 - lam)
    np.add.at(w, (rows, x1), lam)
    return w


def _make_zoom_kernel(b_tile: int, in_h: int, in_w: int,
                      out_h: int, out_w: int, batched: bool):
    def kernel(wh_ref, wwt_ref, x_ref, o_ref, tmp_ref):
        # wh_ref:  (out_h, in_h)      row-interp matrix (VMEM resident)
        # wwt_ref: (in_w, out_w)      transposed col-interp matrix (resident)
        # x_ref:   (b_tile, in_h, in_w)
        # o_ref:   (b_tile, out_h, out_w)
        # tmp_ref: (b_tile*in_h, out_w) scratch (stage-1 result) when batched
        wh = wh_ref[...]
        wwt = wwt_ref[...]

        if batched:
            # Stage 1: column interpolation of all planes in ONE lane-dense
            # MXU matmul.
            x = x_ref[...].astype(wwt.dtype)
            tmp_ref[...] = jnp.dot(
                x.reshape(b_tile * in_h, in_w), wwt,
                preferred_element_type=jnp.float32).astype(tmp_ref.dtype)

        # Stage 2: row interpolation per plane.  fori_loop (not a static
        # Python for) bounds live ranges so larger b_tile does not spike VMEM
        # with unrolled (out_h, out_w) temporaries.
        def body(b, carry):
            if batched:
                start = pl.multiple_of(b * in_h, in_h)
                plane = tmp_ref[pl.ds(start, in_h), :]
            else:
                # in_h not 8-aligned: do stage 1 per plane instead.
                plane = jnp.dot(
                    x_ref[b].astype(wwt.dtype), wwt,
                    preferred_element_type=jnp.float32).astype(wh.dtype)
            o_ref[b] = jnp.dot(
                wh, plane, preferred_element_type=jnp.float32).astype(o_ref.dtype)
            return carry

        jax.lax.fori_loop(0, b_tile, body, 0, unroll=2)

    return kernel


def _choose_b_tile(nc: int, per_plane_bytes: int, budget_bytes: int) -> int:
    """Largest plane tile that (a) divides nc (no plane padding, no post-slice),
    (b) fits the per-generation VMEM budget, and (c) prefers an even grid of
    >= 4 steps so both v7x TensorCores get >= 2 pipelined steps each."""
    max_b = max(1, budget_bytes // max(per_plane_bytes, 1))
    divisors = [d for d in range(1, nc + 1) if nc % d == 0 and d <= max_b]
    if not divisors:
        return 1
    good = [d for d in divisors if (nc // d) >= 4 and (nc // d) % 2 == 0]
    return max(good) if good else max(divisors)


def zoom(img: jnp.ndarray, out_size: int = 384) -> jnp.ndarray:
    """Bilinear resize of an NCHW image to (out_size, out_size), matching
    torch.nn.Upsample(size=(out_size, out_size), mode='bilinear',
    align_corners=False)."""
    n, c, in_h, in_w = img.shape
    nc = n * c
    out_h = out_w = out_size
    itemsize = jnp.dtype(img.dtype).itemsize

    # bf16 MXU operands only when the image itself is bf16 (accuracy gate);
    # accumulation is always f32.
    compute_dtype = jnp.bfloat16 if img.dtype == jnp.bfloat16 else jnp.float32
    w_itemsize = jnp.dtype(compute_dtype).itemsize

    wh = jnp.asarray(_interp_matrix_np(in_h, out_size), dtype=compute_dtype)
    wwt = jnp.asarray(np.ascontiguousarray(_interp_matrix_np(in_w, out_size).T),
                      dtype=compute_dtype)

    # Per-generation VMEM budgeting (v7x: 64 MiB/TC, v5e/v6e: 128 MiB).
    try:
        vmem_cap = int(pltpu.get_tpu_info().vmem_capacity_bytes)
    except Exception:  # query unavailable (e.g. interpret mode)
        vmem_cap = 64 << 20
    budget = min(vmem_cap // 4, 24 << 20)

    fixed = (out_h * in_h + in_w * out_w) * w_itemsize + out_h * out_w * 4
    per_plane = (2 * (out_h * out_w + in_h * in_w) * itemsize  # dbl-buffered out+in
                 + in_h * out_w * w_itemsize)                  # stage-1 scratch
    b_tile = _choose_b_tile(nc, per_plane, max(budget - fixed, per_plane))
    grid = (nc // b_tile,)

    batched = (in_h % 8 == 0)   # fused stage-1 matmul needs 8-aligned planes
    tmp_scratch = (pltpu.VMEM((b_tile * in_h, out_w), compute_dtype)
                   if batched else pltpu.VMEM((8, 128), jnp.float32))

    working_set = fixed + b_tile * per_plane
    vmem_limit = int(min((vmem_cap * 3) // 4,
                         max(32 << 20, working_set + (8 << 20))))

    flops = 2 * nc * (in_h * in_w * out_w + in_h * out_w * out_h)
    bytes_accessed = (nc * (in_h * in_w + out_h * out_w) * itemsize
                      + (out_h * in_h + in_w * out_w) * w_itemsize)

    kernel = _make_zoom_kernel(b_tile, in_h, in_w, out_h, out_w, batched)

    out_flat = pl.pallas_call(
        kernel,
        out_shape=jax.ShapeDtypeStruct((nc, out_h, out_w), img.dtype),
        grid_spec=pltpu.PrefetchScalarGridSpec(
            num_scalar_prefetch=0,
            grid=grid,
            in_specs=[
                # Resident interpolation matrices (constant index_map, fetched
                # once; pipeline_mode=pl.Buffered(1) would shave ~48 KiB more).
                pl.BlockSpec((out_h, in_h), lambda i: (0, 0)),       # Wh
                pl.BlockSpec((in_w, out_w), lambda i: (0, 0)),       # Ww^T
                pl.BlockSpec((b_tile, in_h, in_w), lambda i: (i, 0, 0)),
            ],
            # Unpadded output block (== full trailing dims): no wrapper-side
            # pad or slice pass over the (HBM-write-bound) output.
            out_specs=pl.BlockSpec((b_tile, out_h, out_w), lambda i: (i, 0, 0)),
            scratch_shapes=[tmp_scratch],
        ),
        compiler_params=pltpu.CompilerParams(
            dimension_semantics=("parallel",),
            vmem_limit_bytes=vmem_limit,
        ),
        cost_estimate=pl.CostEstimate(
            flops=flops, transcendentals=0, bytes_accessed=bytes_accessed),
    )(wh, wwt, img.reshape(nc, in_h, in_w))

    return out_flat.reshape(n, c, out_h, out_w)


if __name__ == "__main__":
    key = jax.random.PRNGKey(0)
    img = jax.random.normal(key, (2, 4, 16, 16), dtype=jnp.float32)

    # Unaligned output size (out_w < 128 -> masked stores, still no pad/slice).
    out32 = jax.block_until_ready(zoom(img, out_size=32))
    assert out32.shape == (2, 4, 32, 32) and out32.dtype == img.dtype

    # The module default: 384 is (8,128)-aligned -> fully lane-dense stores.
    out384 = jax.block_until_ready(zoom(img, out_size=384))
    assert out384.shape == (2, 4, 384, 384) and out384.dtype == img.dtype
    assert bool(jnp.all(jnp.isfinite(out384)))

    # Plain-JAX separable bilinear reference built from the same matrices.
    def ref(image, size):
        wh = jnp.asarray(_interp_matrix_np(image.shape[2], size))
        ww = jnp.asarray(_interp_matrix_np(image.shape[3], size))
        return jnp.einsum('oh,bchw,pw->bcop', wh, image, ww,
                          precision=jax.lax.Precision.HIGHEST)

    assert bool(jnp.allclose(out32, ref(img, 32), atol=1e-2, rtol=1e-2))
    assert bool(jnp.allclose(out384, ref(img, 384), atol=1e-2, rtol=1e-2))

    print("KERNEL_OK")
</pallas_src>

<mosaic_0001>
module attributes {stable_mosaic.version = 11 : i64} {
  func.func @kernel(%arg0: i32, %arg1: memref<32x16xf32, #tpu.memory_space<vmem>>, %arg2: memref<16x32xf32, #tpu.memory_space<vmem>>, %arg3: memref<2x16x16xf32, #tpu.memory_space<vmem>>, %arg4: memref<2x32x32xf32, #tpu.memory_space<vmem>>, %arg5: memref<32x32xf32, #tpu.memory_space<vmem>>) attributes {dimension_semantics = [#tpu.dimension_semantics<parallel>], iteration_bounds = array<i64: 4>, scalar_prefetch = 0 : i64, scratch_operands = 1 : i64, tpu.core_type = #tpu.core_type<tc>, window_params = [{pipeline_mode = #tpu.pipeline_mode<synchronous>, transform_indices = @transform_0, window_bounds = array<i64: 32, 16>}, {pipeline_mode = #tpu.pipeline_mode<synchronous>, transform_indices = @transform_1, window_bounds = array<i64: 16, 32>}, {transform_indices = @transform_2, window_bounds = array<i64: 2, 16, 16>}, {transform_indices = @transform_3, window_bounds = array<i64: 2, 32, 32>}]} {
    %c0 = arith.constant 0 : index
    %c0_0 = arith.constant 0 : index
    %0 = vector.load %arg1[%c0, %c0_0] : memref<32x16xf32, #tpu.memory_space<vmem>>, vector<32x16xf32>
    %c0_1 = arith.constant 0 : index
    %c0_2 = arith.constant 0 : index
    %1 = vector.load %arg2[%c0_1, %c0_2] : memref<16x32xf32, #tpu.memory_space<vmem>>, vector<16x32xf32>
    %c0_3 = arith.constant 0 : index
    %c0_4 = arith.constant 0 : index
    %c0_5 = arith.constant 0 : index
    %2 = vector.load %arg3[%c0_3, %c0_4, %c0_5] : memref<2x16x16xf32, #tpu.memory_space<vmem>>, vector<2x16x16xf32>
    %3 = vector.shape_cast %2 : vector<2x16x16xf32> to vector<32x16xf32>
    %cst = arith.constant dense<0.000000e+00> : vector<32x32xf32>
    %4 = tpu.matmul %3, %1, %cst {dimension_numbers = #tpu.dot_dimension_numbers<[1], [0], [0], [1], [0, 0, 1, 1], [], []>} : vector<32x16xf32>, vector<16x32xf32>, vector<32x32xf32> -> vector<32x32xf32>
    %c0_6 = arith.constant 0 : index
    %c0_7 = arith.constant 0 : index
    %5 = vector.load %arg5[%c0_6, %c0_7] : memref<32x32xf32, #tpu.memory_space<vmem>>, vector<32x32xf32>
    tpu.vector_store %arg5[%c0_6, %c0_7], %4 {strides = array<i32>} : memref<32x32xf32, #tpu.memory_space<vmem>>, vector<32x32xf32>,
    %c0_i32 = arith.constant 0 : i32
    %c16_i32 = arith.constant 16 : i32
    %6 = arith.muli %c0_i32, %c16_i32 : i32
    %7 = tpu.assume_multiple %6, 16 : i32
    %8 = arith.index_cast %7 : i32 to index
    %c0_8 = arith.constant 0 : index
    %9 = vector.load %arg5[%8, %c0_8] : memref<32x32xf32, #tpu.memory_space<vmem>>, vector<16x32xf32>
    %cst_9 = arith.constant dense<0.000000e+00> : vector<32x32xf32>
    %10 = tpu.matmul %0, %9, %cst_9 {dimension_numbers = #tpu.dot_dimension_numbers<[1], [0], [0], [1], [0, 0, 1, 1], [], []>} : vector<32x16xf32>, vector<16x32xf32>, vector<32x32xf32> -> vector<32x32xf32>
    %11 = arith.index_cast %c0_i32 : i32 to index
    %c0_10 = arith.constant 0 : index
    %c0_11 = arith.constant 0 : index
    %12 = vector.load %arg4[%11, %c0_10, %c0_11] : memref<2x32x32xf32, #tpu.memory_space<vmem>>, vector<1x32x32xf32>
    %13 = vector.shape_cast %12 : vector<1x32x32xf32> to vector<32x32xf32>
    %14 = vector.shape_cast %10 : vector<32x32xf32> to vector<1x32x32xf32>
    tpu.vector_store %arg4[%11, %c0_10, %c0_11], %14 {strides = array<i32>} : memref<2x32x32xf32, #tpu.memory_space<vmem>>, vector<1x32x32xf32>,
    %c1_i32 = arith.constant 1 : i32
    %c16_i32_12 = arith.constant 16 : i32
    %15 = arith.muli %c1_i32, %c16_i32_12 : i32
    %16 = tpu.assume_multiple %15, 16 : i32
    %17 = arith.index_cast %16 : i32 to index
    %c0_13 = arith.constant 0 : index
    %18 = vector.load %arg5[%17, %c0_13] : memref<32x32xf32, #tpu.memory_space<vmem>>, vector<16x32xf32>
    %cst_14 = arith.constant dense<0.000000e+00> : vector<32x32xf32>
    %19 = tpu.matmul %0, %18, %cst_14 {dimension_numbers = #tpu.dot_dimension_numbers<[1], [0], [0], [1], [0, 0, 1, 1], [], []>} : vector<32x16xf32>, vector<16x32xf32>, vector<32x32xf32> -> vector<32x32xf32>
    %20 = arith.index_cast %c1_i32 : i32 to index
    %c0_15 = arith.constant 0 : index
    %c0_16 = arith.constant 0 : index
    %21 = vector.load %arg4[%20, %c0_15, %c0_16] : memref<2x32x32xf32, #tpu.memory_space<vmem>>, vector<1x32x32xf32>
    %22 = vector.shape_cast %21 : vector<1x32x32xf32> to vector<32x32xf32>
    %23 = vector.shape_cast %19 : vector<32x32xf32> to vector<1x32x32xf32>
    tpu.vector_store %arg4[%20, %c0_15, %c0_16], %23 {strides = array<i32>} : memref<2x32x32xf32, #tpu.memory_space<vmem>>, vector<1x32x32xf32>,
    %c2_i32 = arith.constant 2 : i32
    return
  }
  func.func @transform_0(%arg0: i32) -> (i32, i32) {
    %c0_i32 = arith.constant 0 : i32
    %c0_i32_0 = arith.constant 0 : i32
    %c0_i32_1 = arith.constant 0 : i32
    return %c0_i32, %c0_i32_0 : i32, i32
  }
  func.func @transform_1(%arg0: i32) -> (i32, i32) {
    %c0_i32 = arith.constant 0 : i32
    %c0_i32_0 = arith.constant 0 : i32
    %c0_i32_1 = arith.constant 0 : i32
    return %c0_i32, %c0_i32_0 : i32, i32
  }
  func.func @transform_2(%arg0: i32) -> (i32, i32, i32) {
    %c0_i32 = arith.constant 0 : i32
    %c0_i32_0 = arith.constant 0 : i32
    %c0_i32_1 = arith.constant 0 : i32
    return %arg0, %c0_i32, %c0_i32_0 : i32, i32, i32
  }
  func.func @transform_3(%arg0: i32) -> (i32, i32, i32) {
    %c0_i32 = arith.constant 0 : i32
    %c0_i32_0 = arith.constant 0 : i32
    %c0_i32_1 = arith.constant 0 : i32
    return %arg0, %c0_i32, %c0_i32_0 : i32, i32, i32
  }
}

</mosaic_0001>

<bundles_post_ra>
// kernel: tpu_custom_call.1
= control target key start
LH: loop header
LB: loop body
LE: loop exit
PB: predicated region body
PF: predicated region fallthrough
CT: control target
= control target key end

     0   :  { %8 = vsyncpa [#allocation4], 0  ;;  %s1064_s0 = inlined_call_operand.vmem [shape: f32[32,16], index: 0, kind: input, shape index: {}]   ;;  %s1065_s1 = inlined_call_operand.vmem [shape: f32[16,32], index: 1, kind: input, shape index: {}]   ;;  %s1066_s2 = inlined_call_operand.hbm [shape: f32[8,16,16], index: 2, kind: input, shape index: {}]   ;;  %s1067_s3 = inlined_call_operand.hbm [shape: f32[8,32,32], index: 3, kind: output, shape index: {}]  }
   0x1   :  { %10 = vsyncpa [#allocation4 + $0x1], 0 }
   0x2   :  { %11 = vsyncpa [#allocation5], 0 }
   0x3   :  { %13 = vsyncpa [#allocation5 + $0x1], 0  ;;  %s861_s12 = smov 0   ;;  %s863_s13 = smov 0  }
   0x4   :  { %s865_s14 = smov 0   ;;  %s867_s15 = smov 0  }
   0x5 LB: > { %s882_s16 = sadd.s32 4294967295, %s833_s15   ;;  %s589_s17 = sadd.s32 4294967294, %s833_s15   ;;  %s833_s15 = sphi %s867_s15, %s1079_s15   ;;  %s829_s14 = sphi %s865_s14, %s1078_s14   ;;  %s825_s13 = sphi %s863_s13, %s1077_s13   ;;  %s821_s12 = sphi %s861_s12, %s1076_s12  }
   0x6   : > { %s886_s18 = sadd.s32 1, %s833_s15   ;;  %s68_s19 = sadd.s32 1, %s829_s14 }
   0x7   : > { %s65_s20 = ssub.s32 %s833_s15, %s886_s18  ;;  %p75_p0 = scmp.ne.s32.totalorder %s829_s14, %s825_s13 }
   0x8   : > { %p66_p1 = scmp.eq.s32.totalorder %s65_s20, 0  ;;  %p76_p2 = scmp.eq.s32.totalorder %s833_s15, 0 }
   0x9   : > { %p81_p3 = scmp.ne.s32.totalorder %s825_s13, %s821_s12  ;;  %p82_p4 = scmp.eq.s32.totalorder %s882_s16, 0 }
   0xa   : > { %s898_s21 = scalar_select %p66_p1, %s829_s14, %s68_s19  }
   0xb   : > { %p900_p5 = por %p76_p2, %p75_p0  ;;  %p904_p6 = por %p82_p4, %p81_p3 }
   0xc   : > { %p105_p7 = scmp.eq.s32.totalorder %s882_s16, 3  ;;  %p111_p8 = scmp.eq.s32.totalorder %s589_s17, 3 }
   0xd   : > { %p699_p9 = scmp.lt.s32.totalorder %s833_s15, 4  ;;  %s137_s26 = sand.u32 1, %s829_s14  }
   0xe   : > { %p910_p10 = por %p105_p7, %p75_p0  ;;  %p914_p11 = por %p111_p8, %p81_p3 }
   0xf   : > { %s622_s27 = sshll.u32 %s833_s15, 9  ;;  %s592_s28 = sshll.u32 %s137_s26, 5 }
  0x10   : > { %s1071_s24 = scalar_select %p910_p10, 1, 0 }
  0x11   : > { %s1072_s25 = scalar_select %p914_p11, 1, 0 }
  0x12   : > { %s923_s4 = scalar_lea.hbm %s1066_s2, %s622_s27  ;;  %s141_s5 = scalar_lea.vmem [#allocation3], %s592_s28 }
  0x13   : > { %s149_s6 = sshll.u32 %s141_s5, 4  ;;  %p927_p12 = pnand %p699_p9, %p900_p5  ;;  %s931_s6 = int_to_ptr.vmem [resolvable:$true] %s149_s6 }
  0x14   : > { %s933_s8 = scalar_lea.sflag [#allocation4], %s137_s26  ;;  %s737_s9 = scalar_lea.hbm %s923_s4, 512 }
  0x15   : > { %p738_p13 = scmp.ne.s32.totalorder %s923_s4, %s737_s9  ;;  %p739_p0 = pneg %p927_p12 }
  0x16   : > { %s742_s17 = scalar_lea.hbm %s1066_s2, 2048  ;;  %p743_p3 = scmp.lt.u32.totalorder %s923_s4, %s1066_s2 }
  0x17   : > { %p740_p1 = pnand %p739_p0, %p738_p13  ;;  %p744_p4 = scmp.lt.u32.totalorder %s742_s17, %s737_s9 }
  0x18   : > { %p746_p7 = scmp.lt.u32.totalorder %s737_s9, %s923_s4 }
  0x19   : > { %p741_p2 = pneg %p740_p1  ;;  %p745_p5 = por %p744_p4, %p743_p3 }
  0x1b   : > { %p747_p8 = por %p746_p7, %p745_p5 }
  0x1d   : > { %p748_p9 = pnand %p747_p8, %p741_p2 }
  0x1f   : > { %751 = shalt.err (!%p748_p9)
}
  0x20   : > { %s752_s22 = scalar_lea.vmem %s931_s6, 512  ;;  %s835_s26 = smov [#allocation3]  }
  0x21   : > { %p753_p13 = scmp.ne.s32.totalorder %s931_s6, %s752_s22  ;;  %s757_s27 = sshll.u32 %s835_s26, 4  ;;  %s758_s27 = int_to_ptr.vmem [resolvable:$false] %s757_s27 }
  0x22   : > { %s759_s28 = scalar_lea.vmem %s758_s27, 1024  ;;  %p760_p10 = scmp.lt.s32.totalorder %s931_s6, %s758_s27 }
  0x23   : > { %p755_p1 = pnand %p753_p13, %p739_p0  ;;  %p761_p3 = scmp.lt.s32.totalorder %s759_s28, %s752_s22 }
  0x25   : > { %p756_p11 = pneg %p755_p1  ;;  %p762_p4 = por %p761_p3, %p760_p10 }
  0x27   : > { %p763_p5 = pnand %p762_p4, %p756_p11 }
  0x29   : > { %766 = shalt.err (!%p763_p5)
}
  0x2a   : > { %s836_s29 = smov 128   ;;  %s837_s30 = smov 8  }
  0x2b   : > { %694 = dma.hbm_to_vmem [thread:$0]  (!%p927_p12), %s923_s4, 512, %s931_s6, %s933_s8, %s836_s29, %s836_s29, %s837_s30  }
  0x2c   : > { %p596_p0 = scmp.ge.s32.totalorder %s833_s15, 1  ;;  %p157_p2 = scmp.lt.s32.totalorder %s833_s15, 5 }
  0x2e   : > { %p158_p7 = pnand %p596_p0, %p157_p2 }
  0x2f   : > { %s964_s5 = sand.u32 (!%p158_p7), 1, %s825_s13  }
  0x30   : > { %161 = sbr.rel (%p158_p7) target bundleno = 522 (0x20a), region = 32  ;;  %s597_s9 = sshll.u32 (!%p158_p7), %s964_s5, 5 }
  0x31   : > { %s164_s10 = scalar_lea.sflag (!%p158_p7), [#allocation4], %s964_s5  ;;  %s167_s11 = scalar_lea.vmem (!%p158_p7), [#allocation3], %s597_s9 }
  0x37   : > { %812 = dma.done.wait (%p904_p6), %s164_s10, 512  }
  0x38   : > { %814 = vsyncadd (%p904_p6), %s164_s10, 4294966784  ;;  %vm202_vm0 = vcmask 130048   ;;  %v196_v0 = vld [vmem:[%s1065_s1] sm:$0xff]  ;;  %v197_v1 = vld [vmem:[%s1065_s1 + $0x8] sm:$0xff]  ;;  %vm300_vm1 = vcmask 261120   ;;  %s598_s29 = sshll.u32 %s964_s5, 6 }
  0x39   : > { %v198_v2 = vld [vmem:[%s167_s11] sm:$0xff]  ;;  %v673_v3 = vpack.c.bf16 %v197_v1, %v196_v0  ;;  %v200_v4 = vld [vmem:[%s167_s11 + $0x10] sm:$0xff]  ;;  %v199_v5 = vld [vmem:[%s167_s11 + $0x8] sm:$0xff]  ;;  %s189_s30 = scalar_lea.vmem [#allocation6], %s598_s29  ;;  %s624_s10 = sshll.u32 %s882_s16, 10 }
  0x3a   : > { %647 = vmatprep.mubr.msk.f32.mxu0 %vm202_vm0, %v198_v2  ;;  %650 = vmatprep.mubr.msk.f32.mxu1 %vm202_vm0, %v200_v4  ;;  %v201_v6 = vld [vmem:[%s167_s11 + $0x18] sm:$0xff]  ;;  %v192_v7 = vld [vmem:[%s1064_s0] sm:$0xff]  ;;  %v194_v19 = vld [vmem:[%s1064_s0 + $0x10] sm:$0xff]  ;;  %s516_s9 = sshll.u32 %s189_s30, 4  ;;  %s1017_s16 = scalar_lea.hbm %s1067_s3, %s624_s10  ;;  %s1010_s9 = int_to_ptr.vmem [resolvable:$true] %s516_s9 }
  0x3b   : > { %674 = vmatprep.subr.bf16.mxu0 %v673_v3  ;;  %685 = vmatprep.subr.bf16.mxu1 %v673_v3  ;;  %v193_v18 = vld [vmem:[%s1064_s0 + $0x8] sm:$0xff]  ;;  %v195_v20 = vld [vmem:[%s1064_s0 + $0x18] sm:$0xff]  ;;  %s502_s6 = scalar_lea.sflag [#allocation5], %s964_s5  ;;  %s767_s7 = scalar_lea.vmem %s1010_s9, 1024 }
  0x3c   : > { %676 = vmatpush3.bf16.msra.mxu0 %v673_v3  ;;  %686 = vmatpush3.bf16.msra.mxu1 %v673_v3  ;;  %p768_p6 = scmp.ne.s32.totalorder %s1010_s9, %s767_s7  ;;  %p1074_p10 = scmp.ne.s32.totalorder %s1071_s24, 0 }
  0x3d   : > { %s838_s8 = smov [#allocation6]  }
  0x3e   : > { %p769_p11 = pnand %p768_p6, %p1074_p10  ;;  %s771_s23 = sshll.u32 %s838_s8, 4  ;;  %s772_s23 = int_to_ptr.vmem [resolvable:$false] %s771_s23 }
  0x3f   : > { %648 = vmatmul.mubr.msk.f32.vlgmr.msra.gmra.mrb[0].mxu0 %vm202_vm0, %v199_v5  ;;  %651 = vmatmul.mubr.msk.f32.vlgmr.msra.gmra.mrb[0].mxu1 %vm202_vm0, %v201_v6  ;;  %s773_s17 = scalar_lea.vmem %s772_s23, 2048  ;;  %p774_p8 = scmp.lt.s32.totalorder %s1010_s9, %s772_s23 }
  0x40   : > { %657 = vmatprep.mubr.msk.f32.mxu1 %vm202_vm0, %v192_v7  ;;  %667 = vmatprep.mubr.msk.f32.mxu0 %vm202_vm0, %v192_v7  ;;  %p770_p12 = pneg %p769_p11  ;;  %p775_p9 = scmp.lt.s32.totalorder %s773_s17, %s767_s7 }
  0x42   : > { %p776_p13 = por %p775_p9, %p774_p8 }
  0x44   : > { %p777_p1 = pnand %p776_p13, %p770_p12 }
 0x112   : > { %v649_v8 = vpop.f32.mrb[0].mxu0  ;;  %v652_v9 = vpop.f32.mrb[0].mxu1 }
 0x113   : > { %302 = vst.msk [vmem:[#allocation2 + $0x8] sm:$0xff] %vm300_vm1, %v649_v8  ;;  %304 = vst.msk [vmem:[#allocation2 + $0x18] sm:$0xff] %vm300_vm1, %v652_v9  ;;  %v281_v10 = vpop.f32.mrb[1].mxu0  ;;  %v291_v11 = vpop.f32.mrb[1].mxu1 }
 0x114   : > { %301 = vst.msk [vmem:[#allocation2] sm:$0xff] %vm300_vm1, %v281_v10  ;;  %303 = vst.msk [vmem:[#allocation2 + $0x10] sm:$0xff] %vm300_vm1, %v291_v11 }
 0x11a   : > { %v306_v12 = vld [vmem:[#allocation2 + $0x8] sm:$0xff]  ;;  %v410_v13 = vld [vmem:[#allocation2 + $0x18] sm:$0xff] }
 0x11b   : > { %v305_v14 = vld [vmem:[#allocation2] sm:$0xff]  ;;  %v409_v15 = vld [vmem:[#allocation2 + $0x10] sm:$0xff] }
 0x11c   : > { %v677_v16 = vpack.c.bf16 %v306_v12, %v305_v14  ;;  %v681_v17 = vpack.c.bf16 %v410_v13, %v409_v15 }
 0x11e   : > { %678 = vmatprep.subr.bf16.mxu1 %v677_v16  ;;  %682 = vmatprep.subr.bf16.mxu0 %v681_v17 }
 0x11f   : > { %680 = vmatpush3.bf16.msra.mxu1 %v677_v16  ;;  %684 = vmatpush3.bf16.msra.mxu0 %v681_v17 }
 0x122   : > { %658 = vmatmul.mubr.msk.f32.vlgmr.msra.gmra.mrb[2].mxu1 %vm202_vm0, %v193_v18  ;;  %668 = vmatmul.mubr.msk.f32.vlgmr.msra.gmra.mrb[2].mxu0 %vm202_vm0, %v193_v18 }
 0x123   : > { %660 = vmatprep.mubr.msk.f32.mxu1 %vm202_vm0, %v194_v19  ;;  %670 = vmatprep.mubr.msk.f32.mxu0 %vm202_vm0, %v194_v19 }
 0x126   : > { %661 = vmatmul.mubr.msk.f32.gmra.mrb[4].mxu1 %vm202_vm0, %v195_v20  ;;  %671 = vmatmul.mubr.msk.f32.gmra.mrb[4].mxu0 %vm202_vm0, %v195_v20 }
 0x1f5   : > { %v659_v21 = vpop.f32.mrb[2].mxu1  ;;  %v669_v22 = vpop.f32.mrb[2].mxu0 }
 0x1f6   : > { %405 = vst.msk [vmem:[%s189_s30 + $0x8] sm:$0xff] %vm300_vm1, %v659_v21  ;;  %612 = vst.msk [vmem:[%s189_s30 + $0x28] sm:$0xff] %vm300_vm1, %v669_v22  ;;  %v385_v23 = vpop.f32.mrb[3].mxu1  ;;  %v477_v24 = vpop.f32.mrb[3].mxu0 }
 0x1f7   : > { %404 = vst.msk [vmem:[%s189_s30] sm:$0xff] %vm300_vm1, %v385_v23  ;;  %611 = vst.msk [vmem:[%s189_s30 + $0x20] sm:$0xff] %vm300_vm1, %v477_v24 }
 0x1f9   : > { %v662_v25 = vpop.f32.mrb[4].mxu1  ;;  %v672_v26 = vpop.f32.mrb[4].mxu0 }
 0x1fa   : > { %407 = vst.msk [vmem:[%s189_s30 + $0x18] sm:$0xff] %vm300_vm1, %v662_v25  ;;  %614 = vst.msk [vmem:[%s189_s30 + $0x38] sm:$0xff] %vm300_vm1, %v672_v26  ;;  %v395_v27 = vpop.f32.mrb[5].mxu1  ;;  %v487_v28 = vpop.f32.mrb[5].mxu0 }
 0x1fb   : > { %406 = vst.msk [vmem:[%s189_s30 + $0x10] sm:$0xff] %vm300_vm1, %v395_v27  ;;  %613 = vst.msk [vmem:[%s189_s30 + $0x30] sm:$0xff] %vm300_vm1, %v487_v28 }
 0x1fc   : > { %780 = shalt.err (!%p777_p1)
}
 0x1fd   : > { %s781_s19 = scalar_lea.hbm %s1017_s16, 1024  ;;  %s785_s26 = scalar_lea.hbm %s1067_s3, 4096 }
 0x1fe   : > { %p782_p3 = scmp.ne.s32.totalorder %s1017_s16, %s781_s19  ;;  %p786_p0 = scmp.lt.u32.totalorder %s1017_s16, %s1067_s3 }
 0x1ff   : > { %p787_p2 = scmp.lt.u32.totalorder %s785_s26, %s781_s19  ;;  %p789_p6 = scmp.lt.u32.totalorder %s781_s19, %s1017_s16 }
 0x200   : > { %p783_p4 = pnand %p782_p3, %p1074_p10 }
 0x201   : > { %p788_p7 = por %p787_p2, %p786_p0 }
 0x202   : > { %p784_p5 = pneg %p783_p4 }
 0x203   : > { %p790_p11 = por %p789_p6, %p788_p7 }
 0x205   : > { %p791_p12 = pnand %p790_p11, %p784_p5 }
 0x207   : > { %794 = shalt.err (!%p791_p12)
}
 0x208   : > { %s839_s29 = smov 128   ;;  %s840_s30 = smov 8  }
 0x209   : > { %689 = dma.vmem_to_hbm [thread:$0]  (%p1074_p10), %s1010_s9, 1024, %s1017_s16, %s502_s6, %s839_s29, %s839_s29, %s840_s30  }
 0x20a PF: > { %p700_p8 = scmp.ge.s32.totalorder %s833_s15, 2  ;;  %s531_s10 = sand.u32 1, %s821_s12  }
 0x20b   : > { %p1075_p9 = scmp.ne.s32.totalorder %s1072_s25, 0  ;;  %s532_s11 = scalar_lea.sflag [#allocation5], %s531_s10 }
 0x20d   : > { %p696_p13 = pnand %p700_p8, %p1075_p9 }
 0x20f   : > { %816 = dma.done.wait (!%p696_p13), %s532_s11, 1024  }
 0x210   : > { %818 = vsyncadd (!%p696_p13), %s532_s11, 4294966272  ;;  %p16_p1 = scmp.ge.s32.totalorder %s886_s18, 6   ;;  %s1076_s12 = smov %s825_s13 }
 0x211   : > { %s1077_s13 = smov %s829_s14  ;;  %s1078_s14 = smov %s898_s21 }
 0x212   : > { %s1079_s15 = smov %s886_s18  ;;  %18 = sbr.rel (!%p16_p1) target bundleno = 5 (0x5), region = 79 }
 0x219   :  { %537 = vsyncpa [#allocation4], 1 }
 0x21a   :  { %539 = vsyncpa [#allocation4 + $0x1], 1 }
 0x21b   :  { %540 = vsyncpa [#allocation5], 1 }
 0x21c   :  { %542 = vsyncpa [#allocation5 + $0x1], 1 }

</bundles_post_ra>
